<compile_context>
chip_gen: v6e
topology: v6e:2x2x1
jax: 0.10.0
libtpu: 0.0.40
codegen_flags: <defaults>
</compile_context>

<pallas_src>
import functools

import jax
import jax.numpy as jnp
from jax.experimental import pallas as pl
from jax.experimental.pallas import tpu as pltpu

_LANE = 128


def _round_up(n, m):
    return ((n + m - 1) // m) * m


def _midi_param_kernel(x_ref, w_ref, b_ref, mu_ref, sigma_ref, *, latent_dim):
    # In-kernel bf16 cast (avoids a separate wrapper-side XLA cast pass).
    x = x_ref[...].astype(jnp.bfloat16)
    # Single fused MXU matmul for both heads: bf16 operands, f32 accumulation.
    y = jnp.dot(x, w_ref[...], preferred_element_type=jnp.float32)
    y = y + b_ref[...]  # f32 bias after accumulate

    L = latent_dim
    mu_ref[...] = y[:, :L].astype(mu_ref.dtype)

    # Numerically stable softplus on the sigma lanes only:
    #   softplus(z) = max(z, 0) + log1p(exp(-|z|))
    # TODO(synk): for z < ~-88 this underflows to exactly 0.0 (matches the
    # reference); clamp with a tiny epsilon if downstream takes log(sigma).
    z = y[:, L:2 * L]
    sp = jnp.maximum(z, 0.0) + jnp.log1p(jnp.exp(-jnp.abs(z)))
    sigma_ref[...] = sp.astype(sigma_ref.dtype)


def prepare_midi_params(w_mu, b_mu, w_sigma, b_sigma, lane_pad=_LANE):
    """One-time parameter prep (hoisted out of the per-step call path).

    Builds a fused, lane-dense weight slab:
      w_fused : [F, Np] bf16, cols [0:L) = W_mu^T, [L:2L) = W_sig^T, rest 0
      b_fused : [1, Np] f32   (bias added after the f32 accumulate)
    """
    latent_dim, in_features = w_mu.shape
    n_fused = 2 * latent_dim
    n_pad = _round_up(max(n_fused, lane_pad), lane_pad)

    w_fused = jnp.concatenate(
        [jnp.asarray(w_mu, jnp.float32).T, jnp.asarray(w_sigma, jnp.float32).T],
        axis=1)                                              # [F, 2L]
    w_fused = jnp.pad(w_fused, ((0, 0), (0, n_pad - n_fused)))
    w_fused = w_fused.astype(jnp.bfloat16)

    b_fused = jnp.concatenate(
        [jnp.asarray(b_mu, jnp.float32), jnp.asarray(b_sigma, jnp.float32)])
    b_fused = jnp.pad(b_fused, (0, n_pad - n_fused)).reshape(1, n_pad)

    return dict(w=w_fused, b=b_fused, latent_dim=latent_dim,
                in_features=in_features, n_pad=n_pad)


def _pick_batch_tile(B, batch_tile):
    """Sublane-aligned batch tile; >= 2 grid steps when possible (v7x dual TC)."""
    if B <= 8:
        return B  # single full-extent block (legal as the full batch dim)
    batch_tile = _round_up(batch_tile, 8)
    half = _round_up(pl.cdiv(B, 2), 8)   # at least two grid iterations
    return max(8, min(batch_tile, half))


def midi_parameterize(x, params, *, batch_tile=4096):
    """x: [B, 2H] float32 (cast to bf16 inside the kernel). Returns (mu, sigma)."""
    B, F = x.shape
    assert F == params["in_features"]
    L = params["latent_dim"]
    Np = params["n_pad"]

    tb = _pick_batch_tile(B, batch_tile)
    grid = (pl.cdiv(B, tb),)

    kernel = functools.partial(_midi_param_kernel, latent_dim=L)

    mu, sigma = pl.pallas_call(
        kernel,
        out_shape=(
            jax.ShapeDtypeStruct((B, L), jnp.float32),
            jax.ShapeDtypeStruct((B, L), jnp.float32),
        ),
        grid=grid,
        in_specs=[
            pl.BlockSpec((tb, F), lambda i: (i, 0)),    # x: iterate over batch
            pl.BlockSpec((F, Np), lambda i: (0, 0)),    # fused weight: resident
            pl.BlockSpec((1, Np), lambda i: (0, 0)),    # fused bias: resident
        ],
        out_specs=(
            pl.BlockSpec((tb, L), lambda i: (i, 0)),    # mu
            pl.BlockSpec((tb, L), lambda i: (i, 0)),    # sigma
        ),
        compiler_params=pltpu.CompilerParams(
            dimension_semantics=("parallel",)),
    )(x, params["w"], params["b"])

    return mu, sigma


if __name__ == "__main__":
    lstm_hidden_size = 32
    latent_dim = 16
    batch = 2
    in_features = lstm_hidden_size * 2  # 64

    key = jax.random.PRNGKey(0)
    kx, kwm, kbm, kws, kbs = jax.random.split(key, 5)

    # Deterministic "PyTorch-like" init: U(-1/sqrt(fan_in), 1/sqrt(fan_in)).
    bound = 1.0 / (in_features ** 0.5)
    x = jax.random.normal(kx, (batch, in_features), jnp.float32)
    w_mu = jax.random.uniform(kwm, (latent_dim, in_features), jnp.float32,
                              -bound, bound)
    b_mu = jax.random.uniform(kbm, (latent_dim,), jnp.float32, -bound, bound)
    w_sigma = jax.random.uniform(kws, (latent_dim, in_features), jnp.float32,
                                 -bound, bound)
    b_sigma = jax.random.uniform(kbs, (latent_dim,), jnp.float32, -bound, bound)

    params = prepare_midi_params(w_mu, b_mu, w_sigma, b_sigma)
    mu, sigma = midi_parameterize(x, params)
    jax.block_until_ready((mu, sigma))

    assert mu.shape == (batch, latent_dim)
    assert sigma.shape == (batch, latent_dim)

    # Tight check: reference computed on the same bf16-rounded operands
    # (validates the fused kernel math itself).
    def _bf16_round(a):
        return a.astype(jnp.bfloat16).astype(jnp.float32)

    x_r, wmu_r, wsig_r = _bf16_round(x), _bf16_round(w_mu), _bf16_round(w_sigma)
    hi = jax.lax.Precision.HIGHEST
    mu_ref = jnp.dot(x_r, wmu_r.T, precision=hi) + b_mu
    z_ref = jnp.dot(x_r, wsig_r.T, precision=hi) + b_sigma
    sigma_ref = jnp.logaddexp(z_ref, 0.0)
    assert jnp.allclose(mu, mu_ref, atol=1e-4, rtol=1e-4)
    assert jnp.allclose(sigma, sigma_ref, atol=1e-4, rtol=1e-4)

    # Loose check vs full-f32 module semantics (bf16 MXU inputs, f32 accumulate).
    mu_f32 = x @ w_mu.T + b_mu
    sigma_f32 = jnp.logaddexp(x @ w_sigma.T + b_sigma, 0.0)
    assert jnp.allclose(mu, mu_f32, atol=1e-1, rtol=1e-1)
    assert jnp.allclose(sigma, sigma_f32, atol=1e-1, rtol=1e-1)
    assert bool(jnp.all(sigma > 0.0))

    # Exercise a multi-tile / ragged-batch path as well (B not divisible by tile).
    big_B = 40
    xb = jax.random.normal(kx, (big_B, in_features), jnp.float32)
    mu_b, sigma_b = midi_parameterize(xb, params, batch_tile=16)
    jax.block_until_ready((mu_b, sigma_b))
    xb_r = _bf16_round(xb)
    mu_b_ref = jnp.dot(xb_r, wmu_r.T, precision=hi) + b_mu
    sigma_b_ref = jnp.logaddexp(jnp.dot(xb_r, wsig_r.T, precision=hi) + b_sigma, 0.0)
    assert jnp.allclose(mu_b, mu_b_ref, atol=1e-4, rtol=1e-4)
    assert jnp.allclose(sigma_b, sigma_b_ref, atol=1e-4, rtol=1e-4)

    print("KERNEL_OK")
</pallas_src>

<mosaic_0001>
module attributes {stable_mosaic.version = 11 : i64} {
  func.func @_midi_param_kernel(%arg0: i32, %arg1: memref<2x64xf32, #tpu.memory_space<vmem>>, %arg2: memref<64x128xbf16, #tpu.memory_space<vmem>>, %arg3: memref<1x128xf32, #tpu.memory_space<vmem>>, %arg4: memref<2x16xf32, #tpu.memory_space<vmem>>, %arg5: memref<2x16xf32, #tpu.memory_space<vmem>>) attributes {dimension_semantics = [#tpu.dimension_semantics<parallel>], iteration_bounds = array<i64: 1>, scalar_prefetch = 0 : i64, scratch_operands = 0 : i64, tpu.core_type = #tpu.core_type<tc>, window_params = [{transform_indices = @transform_0, window_bounds = array<i64: 2, 64>}, {pipeline_mode = #tpu.pipeline_mode<synchronous>, transform_indices = @transform_1, window_bounds = array<i64: 64, 128>}, {pipeline_mode = #tpu.pipeline_mode<synchronous>, transform_indices = @transform_2, window_bounds = array<i64: 1, 128>}, {transform_indices = @transform_3, window_bounds = array<i64: 2, 16>}, {transform_indices = @transform_4, window_bounds = array<i64: 2, 16>}]} {
    %c0 = arith.constant 0 : index
    %c0_0 = arith.constant 0 : index
    %0 = vector.load %arg1[%c0, %c0_0] : memref<2x64xf32, #tpu.memory_space<vmem>>, vector<2x64xf32>
    %1 = arith.truncf %0 : vector<2x64xf32> to vector<2x64xbf16>
    %c0_1 = arith.constant 0 : index
    %c0_2 = arith.constant 0 : index
    %2 = vector.load %arg2[%c0_1, %c0_2] : memref<64x128xbf16, #tpu.memory_space<vmem>>, vector<64x128xbf16>
    %cst = arith.constant dense<0.000000e+00> : vector<2x128xf32>
    %3 = tpu.matmul %1, %2, %cst {dimension_numbers = #tpu.dot_dimension_numbers<[1], [0], [0], [1], [0, 0, 1, 1], [], []>} : vector<2x64xbf16>, vector<64x128xbf16>, vector<2x128xf32> -> vector<2x128xf32>
    %c0_3 = arith.constant 0 : index
    %c0_4 = arith.constant 0 : index
    %4 = vector.load %arg3[%c0_3, %c0_4] : memref<1x128xf32, #tpu.memory_space<vmem>>, vector<1x128xf32>
    %5 = vector.broadcast %4 : vector<1x128xf32> to vector<2x128xf32>
    %6 = arith.addf %3, %5 : vector<2x128xf32>
    %7 = vector.extract_strided_slice %6 {offsets = [0, 0], sizes = [2, 16], strides = [1, 1]} : vector<2x128xf32> to vector<2x16xf32>
    %c0_5 = arith.constant 0 : index
    %c0_6 = arith.constant 0 : index
    %8 = vector.load %arg4[%c0_5, %c0_6] : memref<2x16xf32, #tpu.memory_space<vmem>>, vector<2x16xf32>
    tpu.vector_store %arg4[%c0_5, %c0_6], %7 {strides = array<i32>} : memref<2x16xf32, #tpu.memory_space<vmem>>, vector<2x16xf32>,
    %9 = vector.extract_strided_slice %6 {offsets = [0, 16], sizes = [2, 16], strides = [1, 1]} : vector<2x128xf32> to vector<2x16xf32>
    %cst_7 = arith.constant 0.000000e+00 : f32
    %10 = vector.broadcast %cst_7 : f32 to vector<2x16xf32>
    %11 = arith.maximumf %9, %10 : vector<2x16xf32>
    %12 = math.absf %9 : vector<2x16xf32>
    %cst_8 = arith.constant 0.000000e+00 : f32
    %13 = vector.broadcast %cst_8 : f32 to vector<2x16xf32>
    %14 = arith.subf %13, %12 : vector<2x16xf32>
    %15 = math.exp %14 : vector<2x16xf32>
    %16 = math.log1p %15 : vector<2x16xf32>
    %17 = arith.addf %11, %16 : vector<2x16xf32>
    %c0_9 = arith.constant 0 : index
    %c0_10 = arith.constant 0 : index
    %18 = vector.load %arg5[%c0_9, %c0_10] : memref<2x16xf32, #tpu.memory_space<vmem>>, vector<2x16xf32>
    tpu.vector_store %arg5[%c0_9, %c0_10], %17 {strides = array<i32>} : memref<2x16xf32, #tpu.memory_space<vmem>>, vector<2x16xf32>,
    return
  }
  func.func @transform_0(%arg0: i32) -> (i32, i32) {
    %c0_i32 = arith.constant 0 : i32
    %c0_i32_0 = arith.constant 0 : i32
    return %arg0, %c0_i32 : i32, i32
  }
  func.func @transform_1(%arg0: i32) -> (i32, i32) {
    %c0_i32 = arith.constant 0 : i32
    %c0_i32_0 = arith.constant 0 : i32
    %c0_i32_1 = arith.constant 0 : i32
    return %c0_i32, %c0_i32_0 : i32, i32
  }
  func.func @transform_2(%arg0: i32) -> (i32, i32) {
    %c0_i32 = arith.constant 0 : i32
    %c0_i32_0 = arith.constant 0 : i32
    %c0_i32_1 = arith.constant 0 : i32
    return %c0_i32, %c0_i32_0 : i32, i32
  }
  func.func @transform_3(%arg0: i32) -> (i32, i32) {
    %c0_i32 = arith.constant 0 : i32
    %c0_i32_0 = arith.constant 0 : i32
    return %arg0, %c0_i32 : i32, i32
  }
  func.func @transform_4(%arg0: i32) -> (i32, i32) {
    %c0_i32 = arith.constant 0 : i32
    %c0_i32_0 = arith.constant 0 : i32
    return %arg0, %c0_i32 : i32, i32
  }
}

</mosaic_0001>

<bundles_post_ra>
// kernel: tpu_custom_call.1
= control target key start
LH: loop header
LB: loop body
LE: loop exit
PB: predicated region body
PF: predicated region fallthrough
CT: control target
= control target key end

     0   :  { %10 = vsyncpa [#allocation3], 0  ;;  %s361_s0 = inlined_call_operand.hbm [shape: f32[2,64], index: 0, kind: input, shape index: {}]   ;;  %s362_s1 = inlined_call_operand.hbm [shape: bf16[64,128], index: 1, kind: input, shape index: {}]   ;;  %s363_s2 = inlined_call_operand.vmem [shape: f32[1,128], index: 2, kind: input, shape index: {}]   ;;  %s364_s3 = inlined_call_operand.hbm [shape: f32[2,16], index: 3, kind: output, shape index: {0}]   ;;  %s365_s4 = inlined_call_operand.hbm [shape: f32[2,16], index: 4, kind: output, shape index: {1}]  }
   0x1   :  { %11 = vsyncpa [#allocation6], 0 }
   0x2   :  { %12 = vsyncpa [#allocation4], 0 }
   0x3   :  { %13 = vsyncpa [#allocation9], 0  ;;  %s310_s15 = smov [#allocation2]   ;;  %s311_s17 = smov [#allocation5]  }
   0x4   :  { %s20_s16 = sshll.u32 %s310_s15, 4  ;;  %s29_s18 = sshll.u32 %s311_s17, 4  ;;  %s21_s16 = int_to_ptr.vmem [resolvable:$true] %s20_s16  ;;  %s30_s18 = int_to_ptr.vmem [resolvable:$true] %s29_s18 }
   0x5   :  { %s230_s19 = scalar_lea.vmem %s21_s16, 32  ;;  %p235_p1 = scmp.lt.s32.totalorder %s21_s16, %s21_s16 }
   0x6   :  { %p231_p0 = scmp.ne.s32.totalorder %s21_s16, %s230_s19  ;;  %p236_p2 = scmp.lt.s32.totalorder %s230_s19, %s230_s19 }
   0x8   :  { %p237_p3 = por %p236_p2, %p235_p1 }
   0xa   :  { %p238_p4 = pnand %p237_p3, %p231_p0 }
   0xc   :  { %241 = shalt.err (!%p238_p4)
}
   0xd   :  { %23 = dma.hbm_to_vmem [thread:$0]  %s361_s0, 32, %s21_s16, [#allocation3]  }
   0xe   :  { %s250_s22 = scalar_lea.vmem %s30_s18, 512  ;;  %p255_p6 = scmp.lt.s32.totalorder %s30_s18, %s30_s18 }
   0xf   :  { %p251_p5 = scmp.ne.s32.totalorder %s30_s18, %s250_s22  ;;  %p256_p7 = scmp.lt.s32.totalorder %s250_s22, %s250_s22 }
  0x11   :  { %p257_p8 = por %p256_p7, %p255_p6 }
  0x13   :  { %p258_p9 = pnand %p257_p8, %p251_p5 }
  0x15   :  { %261 = shalt.err (!%p258_p9)
}
  0x16   :  { %s312_s23 = smov 64   ;;  %s313_s24 = smov 4  }
  0x17   :  { %35 = dma.hbm_to_vmem [thread:$0]  %s362_s1, 512, %s30_s18, [#allocation6], %s312_s23, %s312_s23, %s313_s24  }
  0x18   :  { %302 = dma.done.wait [#allocation3], 32  }
  0x19   :  { %303 = vsyncadd [#allocation3], 4294967264 }
  0x1a   :  { %304 = dma.done.wait [#allocation6], 512  }
  0x1b   :  { %305 = vsyncadd [#allocation6], 4294966784  ;;  %v314_v0 = vmov 0.0   ;;  %vm315_vm0 = vmmov 0   ;;  %v214_v1 = vld [vmem:[#allocation5 + $0x18] sm:$0xff]   ;;  %v215_v2 = vld [vmem:[#allocation5 + $0x10] sm:$0xff]  }
  0x1c   :  { %193 = vmatprep.subr.bf16.mxu0 %v314_v0  ;;  %201 = vmatprep.mubr.msk.bf16.mxu0 %vm315_vm0, %v314_v0  ;;  %v216_v3 = vld [vmem:[#allocation5 + $0x8] sm:$0xff]   ;;  %v217_v4 = vld [vmem:[#allocation5] sm:$0xff]   ;;  %v45_v5 = vld [vmem:[#allocation2] sm:$0x3]  ;;  %vm86_vm1 = vcmask 523264   ;;  %vm130_vm2 = vcmask 123904  }
  0x1d   :  { %194 = vmatpush3.bf16.msra.mxu0 %v214_v1  ;;  %v46_v6 = vpack.c.bf16 %v45_v5, %v45_v5  ;;  %v182_v7 = vld [vmem:[%s363_s2] ss:$0 sm:$0xff]  ;;  %s316_s27 = smov [#allocation7]  }
  0x1e   :  { %195 = vmatprep.subr.bf16.mxu0 %v314_v0  ;;  %s158_s28 = sshll.u32 %s316_s27, 4  ;;  %s159_s28 = int_to_ptr.vmem [resolvable:$true] %s158_s28 }
  0x1f   :  { %s262_s2 = scalar_lea.vmem %s159_s28, 32  ;;  %p267_p11 = scmp.lt.s32.totalorder %s159_s28, %s159_s28 }
  0x20   :  { %p263_p10 = scmp.ne.s32.totalorder %s159_s28, %s262_s2  ;;  %p268_p12 = scmp.lt.s32.totalorder %s262_s2, %s262_s2 }
  0x21   :  { %196 = vmatpush3.bf16.msra.mxu0 %v215_v2 }
  0x22   :  { %197 = vmatprep.subr.bf16.mxu0 %v314_v0  ;;  %p269_p13 = por %p268_p12, %p267_p11 }
  0x24   :  { %p270_p0 = pnand %p269_p13, %p263_p10 }
  0x25   :  { %198 = vmatpush3.bf16.msra.mxu0 %v216_v3 }
  0x26   :  { %199 = vmatprep.subr.bf16.mxu0 %v314_v0 }
  0x29   :  { %200 = vmatpush3.bf16.msra.mxu0 %v217_v4 }
  0x2c   :  { %202 = vmatmul.mubr.msk.bf16.vlgmr.msra.gmra.mxu0 %vm86_vm1, %v46_v6 }
  0xec   :  { %v124_v8 = vpop.f32.mrf.mxu0 }
  0xed   :  { %v125_v9 = vadd.f32 %v182_v7, %v124_v8 }
  0xee   :  { %v203_v10 = vpop.f32.mrf.mxu0 }
  0xef   :  { %v133_v11 = vand.u32 2147483647, %v125_v9  ;;  %131 = vst.msk [vmem:[#allocation7] sm:$0x3] %vm130_vm2, %v125_v9 }
  0xf0   :  { %v127_v12 = vpop.f32.mrf.mxu0 }
  0xf1   :  { %v134_v13 = vsub.f32 0.0, %v133_v11 }
  0xf2   :  { %v204_v14 = vpop.f32.mrf.mxu0 }
  0xf3   :  { %v135_v15 = vmul.f32 1.442695, %v134_v13 }
  0xf5   :  { %218 = vpow2.f32 %v135_v15 }
 0x102   :  { %v219_v16 = vpop.eup %218 }
 0x103   :  { %v137_v17 = vadd.f32 1.0, %v219_v16  ;;  %v140_v18 = vmul.f32 -0.5, %v219_v16 }
 0x105   :  { %220 = vlog2.f32 %v137_v17 }
 0x106   :  { %273 = shalt.err (!%p270_p0)
}
 0x107   :  { %161 = dma.vmem_to_hbm [thread:$0]  %s159_s28, 32, %s364_s3, [#allocation4]   ;;  %v141_v19 = vadd.f32 1.0, %v140_v18  ;;  %v143_v20 = vand.u32 2147483647, %v219_v16  ;;  %v132_v24 = vmax.f32 %v125_v9, 0.0 }
 0x108   :  { %s317_s5 = smov 112   ;;  %s318_s6 = smov [#allocation8]  }
 0x109   :  { %v142_v23 = vmul.f32 %v219_v16, %v141_v19  ;;  %vm144_vm3 = vcmp.lt.f32.partialorder %v143_v20, 0.0004427343  ;;  %s168_s7 = sshll.u32 %s318_s6, 4  ;;  %s169_s7 = int_to_ptr.vmem [resolvable:$true] %s168_s7 }
 0x10a   :  { %s282_s8 = scalar_lea.vmem %s169_s7, 32  ;;  %p287_p2 = scmp.lt.s32.totalorder %s169_s7, %s169_s7 }
 0x10b   :  { %p283_p1 = scmp.ne.s32.totalorder %s169_s7, %s282_s8  ;;  %p288_p3 = scmp.lt.s32.totalorder %s282_s8, %s282_s8 }
 0x10d   :  { %p289_p4 = por %p288_p3, %p287_p2 }
 0x10f   :  { %p290_p5 = pnand %p289_p4, %p283_p1 }
 0x112   :  { %v221_v21 = vpop.eup %220 }
 0x113   :  { %v139_v22 = vmul.f32 0.6931472, %v221_v21 }
 0x115   :  { %v145_v25 = vsel %vm144_vm3, %v142_v23, %v139_v22 }
 0x116   :  { %v146_v26 = vadd.f32 %v145_v25, %v132_v24 }
 0x118   :  { %148 = vrot.lane.b32.xlu0 %v146_v26, %s317_s5 }
 0x18a   :  { %v149_v27 = vpop.permute.xlu0 %148 }
 0x18b   :  { %151 = vst.msk [vmem:[#allocation8] sm:$0x3] %vm130_vm2, %v149_v27 }
 0x18c   :  { %293 = shalt.err (!%p290_p5)
}
 0x18d   :  { %171 = dma.vmem_to_hbm [thread:$0]  %s169_s7, 32, %s365_s4, [#allocation9]  }
 0x18e   :  { %306 = dma.done.wait [#allocation4], 32  }
 0x18f   :  { %307 = vsyncadd [#allocation4], 4294967264 }
 0x190   :  { %308 = dma.done.wait [#allocation9], 32  }
 0x191   :  { %309 = vsyncadd [#allocation9], 4294967264 }
 0x192   :  { %178 = vsyncpa [#allocation3], 1 }
 0x193   :  { %179 = vsyncpa [#allocation6], 1 }
 0x194   :  { %180 = vsyncpa [#allocation4], 1 }
 0x195   :  { %181 = vsyncpa [#allocation9], 1 }

</bundles_post_ra>
